<compile_context>
chip_gen: v6e
topology: v6e:2x2x1
jax: 0.10.0
libtpu: 0.0.40
codegen_flags: <defaults>
</compile_context>

<pallas_src>
import functools
import math

import jax
import jax.numpy as jnp
from jax import lax
from jax.experimental import pallas as pl
from jax.experimental.pallas import tpu as pltpu


def _pick_tile(dim, target, align):
    """Largest `align`-aligned tile <= target that divides dim.

    Falls back to the full dimension (always a legal block shape) when the
    dim is small or has no aligned divisor below the target.
    """
    if dim <= target:
        return dim
    t = (target // align) * align
    while t >= align:
        if dim % t == 0:
            return t
        t -= align
    return dim


# ----------------------------------------------------------------------
# Kernel 1: tiled linear  y = act( [LN(x)] @ W_t + b ) [+ residual]
#   x: [M, K]   W_t: [K, N] (pre-transposed, bf16)   b: [1, N] (f32)
#   optional fused LayerNorm on the x tile (requires tk == K)
#   optional fused ReLU and residual add in the epilogue
# ----------------------------------------------------------------------
def _linear_kernel(*refs, n_k, activation, has_residual, has_ln, ln_eps):
    idx = 0
    x_ref = refs[idx]; idx += 1
    w_ref = refs[idx]; idx += 1
    b_ref = refs[idx]; idx += 1
    if has_ln:
        g_ref = refs[idx]; idx += 1
        bb_ref = refs[idx]; idx += 1
    if has_residual:
        r_ref = refs[idx]; idx += 1
    o_ref = refs[idx]; idx += 1
    acc_ref = refs[idx]

    k_id = pl.program_id(2)

    @pl.when(k_id == 0)
    def _init():
        acc_ref[...] = jnp.zeros_like(acc_ref)

    x = x_ref[...]
    if has_ln:
        # Fused LayerNorm on the x tile (full reduction dim in this tile).
        xf = x.astype(jnp.float32)
        mean = jnp.mean(xf, axis=-1, keepdims=True)
        xc = xf - mean
        var = jnp.mean(xc * xc, axis=-1, keepdims=True)
        x = xc * lax.rsqrt(var + ln_eps) * g_ref[...] + bb_ref[...]
    if x.dtype != jnp.bfloat16:
        x = x.astype(jnp.bfloat16)

    w = w_ref[...]
    if w.dtype != jnp.bfloat16:
        w = w.astype(jnp.bfloat16)

    # bf16 MXU inputs, f32 accumulation.
    acc_ref[...] += jnp.dot(x, w, preferred_element_type=jnp.float32)

    @pl.when(k_id == n_k - 1)
    def _finalize():
        y = acc_ref[...] + b_ref[...]
        if activation == "relu":
            y = jnp.maximum(y, 0.0)
        if has_residual:
            y = y + r_ref[...].astype(jnp.float32)
        o_ref[...] = y.astype(o_ref.dtype)


def linear_pallas(x2d, w_t, b, *, ln=None, residual=None, activation=None,
                  out_dtype=jnp.bfloat16, tm=256, tn=256, tk=512, ln_eps=1e-5):
    m, k = x2d.shape
    k2, n = w_t.shape
    assert k == k2
    tm = _pick_tile(m, tm, 8)
    tn = _pick_tile(n, tn, 128)
    # LN fusion needs the whole reduction dim inside one x tile.
    tk = k if ln is not None else _pick_tile(k, tk, 128)
    grid = (m // tm, n // tn, k // tk)

    in_specs = [
        pl.BlockSpec((tm, tk), lambda i, j, kk: (i, kk)),
        pl.BlockSpec((tk, tn), lambda i, j, kk: (kk, j)),
        pl.BlockSpec((1, tn), lambda i, j, kk: (0, j)),
    ]
    args = [x2d, w_t, b.reshape(1, n).astype(jnp.float32)]
    if ln is not None:
        gamma, beta = ln
        in_specs.append(pl.BlockSpec((1, tk), lambda i, j, kk: (0, kk)))
        in_specs.append(pl.BlockSpec((1, tk), lambda i, j, kk: (0, kk)))
        args.append(gamma.reshape(1, k).astype(jnp.float32))
        args.append(beta.reshape(1, k).astype(jnp.float32))
    if residual is not None:
        in_specs.append(pl.BlockSpec((tm, tn), lambda i, j, kk: (i, j)))
        args.append(residual)

    kernel = functools.partial(
        _linear_kernel, n_k=grid[2], activation=activation,
        has_residual=residual is not None, has_ln=ln is not None, ln_eps=ln_eps)

    # TODO(synk): raise vmem_limit_bytes per target (v6e 128 MiB / v7x 64 MiB)
    #             when scaling tm/tn/tk up for large shapes.
    return pl.pallas_call(
        kernel,
        out_shape=jax.ShapeDtypeStruct((m, n), out_dtype),
        grid=grid,
        in_specs=in_specs,
        out_specs=pl.BlockSpec((tm, tn), lambda i, j, kk: (i, j)),
        scratch_shapes=[pltpu.VMEM((tm, tn), jnp.float32)],
        compiler_params=pltpu.CompilerParams(
            dimension_semantics=("parallel", "parallel", "arbitrary")),
    )(*args)


# ----------------------------------------------------------------------
# Kernel 2: multi-head scaled dot-product attention.
# One batch per grid step; heads processed one at a time (bounded liveness).
#   qkv:      [B*S, 3*D]  bf16 (scale already folded into the Q projection)
#   key_mask: [B, 1, S]   f32  (1 = attend, 0 = masked)
#   out:      [B*S, D]    bf16 lane-dense row slab -> feeds output projection
# ----------------------------------------------------------------------
def _attention_kernel(qkv_ref, msk_ref, o_ref, *, n_heads, d_k):
    d_model = n_heads * d_k
    # Additive key-mask bias built in-kernel: 0 where attend, -1e9 where masked.
    bias = (msk_ref[0].astype(jnp.float32) - 1.0) * 1e9        # [1, S]

    qkv = qkv_ref[...]                                          # [S, 3*D] bf16
    for hi in range(n_heads):                                   # static unroll
        lo = hi * d_k
        qh = qkv[:, lo:lo + d_k]
        kh = qkv[:, d_model + lo:d_model + lo + d_k]
        vh = qkv[:, 2 * d_model + lo:2 * d_model + lo + d_k]

        # Q @ K^T without an explicit transpose (contract last dims).
        s = lax.dot_general(qh, kh, (((1,), (1,)), ((), ())),
                            preferred_element_type=jnp.float32)  # [S, S] f32
        s = s + bias

        # numerically stable softmax, statistics in f32
        s_max = jnp.max(s, axis=-1, keepdims=True)
        p = jnp.exp(s - s_max)
        p = p * pl.reciprocal(jnp.sum(p, axis=-1, keepdims=True), approx=True)

        oh = jnp.dot(p.astype(jnp.bfloat16), vh,
                     preferred_element_type=jnp.float32)         # [S, d_k]
        o_ref[:, lo:lo + d_k] = oh.astype(o_ref.dtype)


def attention_pallas(qkv2d, key_mask, *, batch, seq, n_heads, d_k):
    d_model = n_heads * d_k
    kernel = functools.partial(_attention_kernel, n_heads=n_heads, d_k=d_k)
    return pl.pallas_call(
        kernel,
        out_shape=jax.ShapeDtypeStruct((batch * seq, d_model), jnp.bfloat16),
        grid=(batch,),
        in_specs=[
            pl.BlockSpec((seq, 3 * d_model), lambda bi: (bi, 0)),
            pl.BlockSpec((1, 1, seq), lambda bi: (bi, 0, 0)),
        ],
        out_specs=pl.BlockSpec((seq, d_model), lambda bi: (bi, 0)),
        compiler_params=pltpu.CompilerParams(dimension_semantics=("parallel",)),
    )(qkv2d, key_mask)


# ----------------------------------------------------------------------
# Parameter prep (one-time layout plumbing):
#   fuse QKV, fold 1/sqrt(d_k) into Wq/bq, pre-transpose, cast weights to bf16.
# Raw weights are in PyTorch nn.Linear layout W[out, in].
# ----------------------------------------------------------------------
def prepare_params(raw, *, n_heads):
    d_model = raw["wq"].shape[0]
    d_k = d_model // n_heads
    scale = 1.0 / math.sqrt(d_k)

    wq = raw["wq"] * scale
    bq = raw["bq"] * scale
    w_qkv = jnp.concatenate([wq, raw["wk"], raw["wv"]], axis=0)      # [3D, D]
    b_qkv = jnp.concatenate([bq, raw["bk"], raw["bv"]], axis=0)      # [3D]

    bf = jnp.bfloat16
    f32 = jnp.float32
    return {
        "ln1_g": raw["ln1_g"].astype(f32), "ln1_b": raw["ln1_b"].astype(f32),
        "ln2_g": raw["ln2_g"].astype(f32), "ln2_b": raw["ln2_b"].astype(f32),
        "w_qkv_t": w_qkv.T.astype(bf), "b_qkv": b_qkv.astype(f32),
        "wo_t": raw["wo"].T.astype(bf), "bo": raw["bo"].astype(f32),
        "w1_t": raw["w1"].T.astype(bf), "b1": raw["b1"].astype(f32),
        "w2_t": raw["w2"].T.astype(bf), "b2": raw["b2"].astype(f32),
    }


# ----------------------------------------------------------------------
# Full EncoderLayer forward
#   x: [B, S, D]   mask: [B, S] key-padding mask (1 = attend, 0 = masked)
# ----------------------------------------------------------------------
def encoder_layer(params, x, mask, *, n_heads):
    b, s, d_model = x.shape
    d_k = d_model // n_heads
    assert s % 8 == 0 or b == 1, "seq must be a multiple of 8 when batch > 1"

    x2d = x.reshape(b * s, d_model).astype(jnp.float32)
    key_mask = mask.reshape(b, 1, s).astype(jnp.float32)

    # sublayer 0: x + self_attn(LN1(x))   (LN1 fused into the QKV projection)
    qkv = linear_pallas(x2d, params["w_qkv_t"], params["b_qkv"],
                        ln=(params["ln1_g"], params["ln1_b"]))       # bf16 [M, 3D]
    a = attention_pallas(qkv, key_mask, batch=b, seq=s,
                         n_heads=n_heads, d_k=d_k)                   # bf16 [M, D]
    x2d = linear_pallas(a, params["wo_t"], params["bo"],
                        residual=x2d, out_dtype=jnp.float32)

    # sublayer 1: x + FFN(LN2(x))         (LN2 fused into the first FFN matmul)
    f = linear_pallas(x2d, params["w1_t"], params["b1"],
                      ln=(params["ln2_g"], params["ln2_b"]),
                      activation="relu")                             # bf16 [M, D_ff]
    x2d = linear_pallas(f, params["w2_t"], params["b2"],
                        residual=x2d, out_dtype=jnp.float32)

    return x2d.reshape(b, s, d_model)


# ----------------------------------------------------------------------
# Pure-JAX (f32) reference for verification
# ----------------------------------------------------------------------
def reference(raw, x, mask, *, n_heads):
    b, s, d_model = x.shape
    d_k = d_model // n_heads

    def ln(t, g, bb, eps=1e-5):
        mu = jnp.mean(t, axis=-1, keepdims=True)
        var = jnp.mean((t - mu) ** 2, axis=-1, keepdims=True)
        return (t - mu) / jnp.sqrt(var + eps) * g + bb

    def lin(t, w, bb):
        return t @ w.T + bb

    # sublayer 0
    h = ln(x, raw["ln1_g"], raw["ln1_b"])
    q = lin(h, raw["wq"], raw["bq"]).reshape(b, s, n_heads, d_k).transpose(0, 2, 1, 3)
    k = lin(h, raw["wk"], raw["bk"]).reshape(b, s, n_heads, d_k).transpose(0, 2, 1, 3)
    v = lin(h, raw["wv"], raw["bv"]).reshape(b, s, n_heads, d_k).transpose(0, 2, 1, 3)
    scores = jnp.einsum("bhqd,bhkd->bhqk", q, k) / math.sqrt(d_k)
    scores = jnp.where(mask[:, None, None, :] == 0, -1e9, scores)
    p = jax.nn.softmax(scores, axis=-1)
    a = jnp.einsum("bhqk,bhkd->bhqd", p, v).transpose(0, 2, 1, 3).reshape(b, s, d_model)
    x = x + lin(a, raw["wo"], raw["bo"])

    # sublayer 1
    h = ln(x, raw["ln2_g"], raw["ln2_b"])
    f = jnp.maximum(lin(h, raw["w1"], raw["b1"]), 0.0)
    return x + lin(f, raw["w2"], raw["b2"])


if __name__ == "__main__":
    B, S, D_MODEL, H, D_FF = 2, 8, 32, 4, 64

    root = jax.random.PRNGKey(0)
    keys = jax.random.split(root, 20)
    sc = 1.0 / math.sqrt(D_MODEL)
    sc_ff = 1.0 / math.sqrt(D_FF)

    raw = {
        "wq": sc * jax.random.normal(keys[0], (D_MODEL, D_MODEL), jnp.float32),
        "bq": sc * jax.random.normal(keys[1], (D_MODEL,), jnp.float32),
        "wk": sc * jax.random.normal(keys[2], (D_MODEL, D_MODEL), jnp.float32),
        "bk": sc * jax.random.normal(keys[3], (D_MODEL,), jnp.float32),
        "wv": sc * jax.random.normal(keys[4], (D_MODEL, D_MODEL), jnp.float32),
        "bv": sc * jax.random.normal(keys[5], (D_MODEL,), jnp.float32),
        "wo": sc * jax.random.normal(keys[6], (D_MODEL, D_MODEL), jnp.float32),
        "bo": sc * jax.random.normal(keys[7], (D_MODEL,), jnp.float32),
        "w1": sc * jax.random.normal(keys[8], (D_FF, D_MODEL), jnp.float32),
        "b1": sc * jax.random.normal(keys[9], (D_FF,), jnp.float32),
        "w2": sc_ff * jax.random.normal(keys[10], (D_MODEL, D_FF), jnp.float32),
        "b2": sc_ff * jax.random.normal(keys[11], (D_MODEL,), jnp.float32),
        "ln1_g": 1.0 + 0.1 * jax.random.normal(keys[12], (D_MODEL,), jnp.float32),
        "ln1_b": 0.1 * jax.random.normal(keys[13], (D_MODEL,), jnp.float32),
        "ln2_g": 1.0 + 0.1 * jax.random.normal(keys[14], (D_MODEL,), jnp.float32),
        "ln2_b": 0.1 * jax.random.normal(keys[15], (D_MODEL,), jnp.float32),
    }
    params = prepare_params(raw, n_heads=H)

    x = jax.random.normal(keys[16], (B, S, D_MODEL), jnp.float32)
    # key-padding mask: 1 = attend, 0 = masked; mask last 2 key positions of batch 1
    mask = jnp.ones((B, S), jnp.float32)
    mask = mask.at[1, -2:].set(0.0)

    out = encoder_layer(params, x, mask, n_heads=H)
    out = jax.block_until_ready(out)

    ref = reference(raw, x, mask, n_heads=H)
    assert out.shape == (B, S, D_MODEL)
    # bf16 weights/intermediates + approx reciprocal -> relaxed tolerance vs f32
    assert jnp.allclose(out, ref, atol=5e-2, rtol=5e-2), "mismatch vs reference"

    print("KERNEL_OK")
</pallas_src>

<mosaic_0001>
module attributes {stable_mosaic.version = 11 : i64} {
  func.func @_linear_kernel(%arg0: i32, %arg1: i32, %arg2: i32, %arg3: memref<16x32xf32, #tpu.memory_space<vmem>>, %arg4: memref<32x96xbf16, #tpu.memory_space<vmem>>, %arg5: memref<1x96xf32, #tpu.memory_space<vmem>>, %arg6: memref<1x32xf32, #tpu.memory_space<vmem>>, %arg7: memref<1x32xf32, #tpu.memory_space<vmem>>, %arg8: memref<16x96xbf16, #tpu.memory_space<vmem>>, %arg9: memref<16x96xf32, #tpu.memory_space<vmem>>) attributes {dimension_semantics = [#tpu.dimension_semantics<parallel>, #tpu.dimension_semantics<parallel>, #tpu.dimension_semantics<arbitrary>], iteration_bounds = array<i64: 1, 1, 1>, scalar_prefetch = 0 : i64, scratch_operands = 1 : i64, tpu.core_type = #tpu.core_type<tc>, window_params = [{transform_indices = @transform_0, window_bounds = array<i64: 16, 32>}, {transform_indices = @transform_1, window_bounds = array<i64: 32, 96>}, {transform_indices = @transform_2, window_bounds = array<i64: 1, 96>}, {transform_indices = @transform_3, window_bounds = array<i64: 1, 32>}, {transform_indices = @transform_4, window_bounds = array<i64: 1, 32>}, {transform_indices = @transform_5, window_bounds = array<i64: 16, 96>}]} {
    %c0_i32 = arith.constant 0 : i32
    %0 = arith.cmpi eq, %arg2, %c0_i32 : i32
    %1 = arith.extui %0 : i1 to i32
    %c0_i32_0 = arith.constant 0 : i32
    %2 = arith.cmpi ne, %1, %c0_i32_0 : i32
    scf.if %2 {
      %cst_19 = arith.constant 0.000000e+00 : f32
      %35 = vector.broadcast %cst_19 : f32 to vector<16x96xf32>
      %c0_20 = arith.constant 0 : index
      %c0_21 = arith.constant 0 : index
      %36 = vector.load %arg9[%c0_20, %c0_21] : memref<16x96xf32, #tpu.memory_space<vmem>>, vector<16x96xf32>
      tpu.vector_store %arg9[%c0_20, %c0_21], %35 {strides = array<i32>} : memref<16x96xf32, #tpu.memory_space<vmem>>, vector<16x96xf32>,
    } else {
    }
    %c0 = arith.constant 0 : index
    %c0_1 = arith.constant 0 : index
    %3 = vector.load %arg3[%c0, %c0_1] : memref<16x32xf32, #tpu.memory_space<vmem>>, vector<16x32xf32>
    %cst = arith.constant dense<0.000000e+00> : vector<16xf32>
    %4 = vector.multi_reduction <add>, %3, %cst [1] : vector<16x32xf32> to vector<16xf32>
    %5 = vector.shape_cast %4 : vector<16xf32> to vector<16x1xf32>
    %cst_2 = arith.constant 3.200000e+01 : f32
    %6 = vector.broadcast %cst_2 : f32 to vector<16x1xf32>
    %7 = arith.divf %5, %6 : vector<16x1xf32>
    %8 = vector.broadcast %7 : vector<16x1xf32> to vector<16x32xf32>
    %9 = arith.subf %3, %8 : vector<16x32xf32>
    %10 = arith.mulf %9, %9 : vector<16x32xf32>
    %cst_3 = arith.constant dense<0.000000e+00> : vector<16xf32>
    %11 = vector.multi_reduction <add>, %10, %cst_3 [1] : vector<16x32xf32> to vector<16xf32>
    %12 = vector.shape_cast %11 : vector<16xf32> to vector<16x1xf32>
    %cst_4 = arith.constant 3.200000e+01 : f32
    %13 = vector.broadcast %cst_4 : f32 to vector<16x1xf32>
    %14 = arith.divf %12, %13 : vector<16x1xf32>
    %cst_5 = arith.constant 9.99999974E-6 : f32
    %15 = vector.broadcast %cst_5 : f32 to vector<16x1xf32>
    %16 = arith.addf %14, %15 : vector<16x1xf32>
    %17 = math.rsqrt %16 : vector<16x1xf32>
    %18 = vector.broadcast %17 : vector<16x1xf32> to vector<16x32xf32>
    %19 = arith.mulf %9, %18 : vector<16x32xf32>
    %c0_6 = arith.constant 0 : index
    %c0_7 = arith.constant 0 : index
    %20 = vector.load %arg6[%c0_6, %c0_7] : memref<1x32xf32, #tpu.memory_space<vmem>>, vector<1x32xf32>
    %21 = vector.broadcast %20 : vector<1x32xf32> to vector<16x32xf32>
    %22 = arith.mulf %19, %21 : vector<16x32xf32>
    %c0_8 = arith.constant 0 : index
    %c0_9 = arith.constant 0 : index
    %23 = vector.load %arg7[%c0_8, %c0_9] : memref<1x32xf32, #tpu.memory_space<vmem>>, vector<1x32xf32>
    %24 = vector.broadcast %23 : vector<1x32xf32> to vector<16x32xf32>
    %25 = arith.addf %22, %24 : vector<16x32xf32>
    %26 = arith.truncf %25 : vector<16x32xf32> to vector<16x32xbf16>
    %c0_10 = arith.constant 0 : index
    %c0_11 = arith.constant 0 : index
    %27 = vector.load %arg4[%c0_10, %c0_11] : memref<32x96xbf16, #tpu.memory_space<vmem>>, vector<32x96xbf16>
    %c0_12 = arith.constant 0 : index
    %c0_13 = arith.constant 0 : index
    %28 = vector.load %arg9[%c0_12, %c0_13] : memref<16x96xf32, #tpu.memory_space<vmem>>, vector<16x96xf32>
    %cst_14 = arith.constant dense<0.000000e+00> : vector<16x96xf32>
    %29 = tpu.matmul %26, %27, %cst_14 {dimension_numbers = #tpu.dot_dimension_numbers<[1], [0], [0], [1], [0, 0, 1, 1], [], []>} : vector<16x32xbf16>, vector<32x96xbf16>, vector<16x96xf32> -> vector<16x96xf32>
    %30 = arith.addf %28, %29 : vector<16x96xf32>
    %c0_15 = arith.constant 0 : index
    %c0_16 = arith.constant 0 : index
    %31 = vector.load %arg9[%c0_15, %c0_16] : memref<16x96xf32, #tpu.memory_space<vmem>>, vector<16x96xf32>
    tpu.vector_store %arg9[%c0_15, %c0_16], %30 {strides = array<i32>} : memref<16x96xf32, #tpu.memory_space<vmem>>, vector<16x96xf32>,
    %c0_i32_17 = arith.constant 0 : i32
    %32 = arith.cmpi eq, %arg2, %c0_i32_17 : i32
    %33 = arith.extui %32 : i1 to i32
    %c0_i32_18 = arith.constant 0 : i32
    %34 = arith.cmpi ne, %33, %c0_i32_18 : i32
    scf.if %34 {
      %c0_19 = arith.constant 0 : index
      %c0_20 = arith.constant 0 : index
      %35 = vector.load %arg9[%c0_19, %c0_20] : memref<16x96xf32, #tpu.memory_space<vmem>>, vector<16x96xf32>
      %c0_21 = arith.constant 0 : index
      %c0_22 = arith.constant 0 : index
      %36 = vector.load %arg5[%c0_21, %c0_22] : memref<1x96xf32, #tpu.memory_space<vmem>>, vector<1x96xf32>
      %37 = vector.broadcast %36 : vector<1x96xf32> to vector<16x96xf32>
      %38 = arith.addf %35, %37 : vector<16x96xf32>
      %39 = arith.truncf %38 : vector<16x96xf32> to vector<16x96xbf16>
      %c0_23 = arith.constant 0 : index
      %c0_24 = arith.constant 0 : index
      %40 = vector.load %arg8[%c0_23, %c0_24] : memref<16x96xbf16, #tpu.memory_space<vmem>>, vector<16x96xbf16>
      tpu.vector_store %arg8[%c0_23, %c0_24], %39 {strides = array<i32>} : memref<16x96xbf16, #tpu.memory_space<vmem>>, vector<16x96xbf16>,
    } else {
    }
    return
  }
  func.func @transform_0(%arg0: i32, %arg1: i32, %arg2: i32) -> (i32, i32) {
    %c0_i32 = arith.constant 0 : i32
    return %arg0, %arg2 : i32, i32
  }
  func.func @transform_1(%arg0: i32, %arg1: i32, %arg2: i32) -> (i32, i32) {
    %c0_i32 = arith.constant 0 : i32
    return %arg2, %arg1 : i32, i32
  }
  func.func @transform_2(%arg0: i32, %arg1: i32, %arg2: i32) -> (i32, i32) {
    %c0_i32 = arith.constant 0 : i32
    %c0_i32_0 = arith.constant 0 : i32
    return %c0_i32, %arg1 : i32, i32
  }
  func.func @transform_3(%arg0: i32, %arg1: i32, %arg2: i32) -> (i32, i32) {
    %c0_i32 = arith.constant 0 : i32
    %c0_i32_0 = arith.constant 0 : i32
    return %c0_i32, %arg2 : i32, i32
  }
  func.func @transform_4(%arg0: i32, %arg1: i32, %arg2: i32) -> (i32, i32) {
    %c0_i32 = arith.constant 0 : i32
    %c0_i32_0 = arith.constant 0 : i32
    return %c0_i32, %arg2 : i32, i32
  }
  func.func @transform_5(%arg0: i32, %arg1: i32, %arg2: i32) -> (i32, i32) {
    %c0_i32 = arith.constant 0 : i32
    return %arg0, %arg1 : i32, i32
  }
}

</mosaic_0001>

<bundles_post_ra>
// kernel: tpu_custom_call.1
= control target key start
LH: loop header
LB: loop body
LE: loop exit
PB: predicated region body
PF: predicated region fallthrough
CT: control target
= control target key end

     0   :  { %10 = vsyncpa [#allocation4], 0  ;;  %s390_s0 = inlined_call_operand.hbm [shape: f32[16,32], index: 0, kind: input, shape index: {}]   ;;  %s391_s1 = inlined_call_operand.hbm [shape: bf16[32,96], index: 1, kind: input, shape index: {}]   ;;  %s392_s2 = inlined_call_operand.vmem [shape: f32[1,96], index: 2, kind: input, shape index: {}]   ;;  %s393_s3 = inlined_call_operand.vmem [shape: f32[1,32], index: 3, kind: input, shape index: {}]   ;;  %s394_s4 = inlined_call_operand.vmem [shape: f32[1,32], index: 4, kind: input, shape index: {}]   ;;  %s395_s5 = inlined_call_operand.hbm [shape: bf16[16,96], index: 5, kind: output, shape index: {}]  }
   0x1   :  { %11 = vsyncpa [#allocation7], 0 }
   0x2   :  { %12 = vsyncpa [#allocation5], 0  ;;  %s318_s18 = smov [#allocation3]  }
   0x3   :  { %s18_s19 = sshll.u32 %s318_s18, 4  ;;  %s19_s19 = int_to_ptr.vmem [resolvable:$true] %s18_s19 }
   0x4   :  { %s260_s20 = scalar_lea.vmem %s19_s19, 256  ;;  %p265_p1 = scmp.lt.s32.totalorder %s19_s19, %s19_s19 }
   0x5   :  { %p261_p0 = scmp.ne.s32.totalorder %s19_s19, %s260_s20  ;;  %p266_p2 = scmp.lt.s32.totalorder %s260_s20, %s260_s20 }
   0x7   :  { %p267_p3 = por %p266_p2, %p265_p1 }
   0x9   :  { %p268_p4 = pnand %p267_p3, %p261_p0 }
   0xb   :  { %271 = shalt.err (!%p268_p4)
}
   0xc   :  { %s319_s21 = smov 128   ;;  %s320_s22 = smov 8  }
   0xd   :  { %24 = dma.hbm_to_vmem [thread:$0]  %s390_s0, 256, %s19_s19, [#allocation4], %s319_s21, %s319_s21, %s320_s22  }
   0xe   :  { %s321_s25 = smov [#allocation6]  }
   0xf   :  { %s30_s26 = sshll.u32 %s321_s25, 4  ;;  %s31_s26 = int_to_ptr.vmem [resolvable:$true] %s30_s26 }
  0x10   :  { %s280_s27 = scalar_lea.vmem %s31_s26, 256  ;;  %p285_p6 = scmp.lt.s32.totalorder %s31_s26, %s31_s26 }
  0x11   :  { %p281_p5 = scmp.ne.s32.totalorder %s31_s26, %s280_s27  ;;  %p286_p7 = scmp.lt.s32.totalorder %s280_s27, %s280_s27 }
  0x13   :  { %p287_p8 = por %p286_p7, %p285_p6 }
  0x15   :  { %p288_p9 = pnand %p287_p8, %p281_p5 }
  0x17   :  { %291 = shalt.err (!%p288_p9)
}
  0x18   :  { %s322_s28 = smov 64   ;;  %s323_s29 = smov 4  }
  0x19   :  { %36 = dma.hbm_to_vmem [thread:$0]  %s391_s1, 256, %s31_s26, [#allocation7], %s322_s28, %s322_s28, %s323_s29  }
  0x1a   :  { %312 = dma.done.wait [#allocation4], 256  }
  0x1b   :  { %313 = vsyncadd [#allocation4], 4294967040 }
  0x1c   :  { %314 = dma.done.wait [#allocation7], 256  }
  0x1d   :  { %315 = vsyncadd [#allocation7], 4294967040  ;;  %vm59_vm0 = vcmask 261120   ;;  %v57_v0 = vld [vmem:[#allocation3] sm:$0xff]  ;;  %v58_v1 = vld [vmem:[#allocation3 + $0x8] sm:$0xff]  ;;  %vm54_vm1 = vcmask 785408  }
  0x1e   :  { %v60_v2 = vsel %vm59_vm0, %v57_v0, 0.0  ;;  %v63_v3 = vsel %vm59_vm0, %v58_v1, 0.0  ;;  %v246_v14 = vld [vmem:[#allocation6 + $0x8] sm:$0xff]   ;;  %v324_v15 = vmov 0.0   ;;  %vm325_vm2 = vmmov 0   ;;  %v247_v16 = vld [vmem:[#allocation6] sm:$0xff]  }
  0x1f   :  { %61 = vadd.xlane.f32.xlu0 %v60_v2  ;;  %55 = vst.msk [vmem:[#allocation2] sm:$0xff] %vm54_vm1, %v324_v15  ;;  %56 = vst.msk [vmem:[#allocation2 + $0x8] sm:$0xff] %vm54_vm1, %v324_v15  ;;  %229 = vmatprep.subr.bf16.mxu0 %v324_v15  ;;  %v216_v25 = vld [vmem:[%s393_s3] ss:$0 sm:$0xff]  ;;  %vm195_vm3 = vcmask 781312   ;;  %s326_s9 = smov [#allocation8]  }
  0x20   :  { %233 = vmatprep.mubr.msk.bf16.mxu0 %vm325_vm2, %v324_v15  ;;  %230 = vmatpush3.bf16.msra.mxu0 %v246_v14  ;;  %v217_v29 = vld [vmem:[%s394_s4] ss:$0 sm:$0xff]  ;;  %s203_s10 = sshll.u32 %s326_s9, 4  ;;  %s204_s10 = int_to_ptr.vmem [resolvable:$true] %s203_s10 }
  0x21   :  { %231 = vmatprep.subr.bf16.mxu0 %v324_v15  ;;  %v221_v42 = vld [vmem:[%s392_s2] ss:$0 sm:$0xff]  ;;  %s292_s11 = scalar_lea.vmem %s204_s10, 128  ;;  %p297_p11 = scmp.lt.s32.totalorder %s204_s10, %s204_s10 }
  0x22   :  { %p293_p10 = scmp.ne.s32.totalorder %s204_s10, %s292_s11  ;;  %p298_p12 = scmp.lt.s32.totalorder %s292_s11, %s292_s11 }
  0x23   :  { %64 = vadd.xlane.f32.xlu0 %v63_v3 }
  0x24   :  { %232 = vmatpush3.bf16.msra.mxu0 %v247_v16  ;;  %p299_p13 = por %p298_p12, %p297_p11 }
  0x26   :  { %v110_v34 = vld [vmem:[#allocation2] sm:$0xff]  ;;  %v111_v38 = vld [vmem:[#allocation2 + $0x8] sm:$0xff]  ;;  %p300_p0 = pnand %p299_p13, %p293_p10 }
  0xa8   :  { %v62_v4 = vpop.xlane.xlu0 %61 }
  0xa9   :  { %v67_v5 = vmul.f32 0.03125, %v62_v4 }
  0xab   :  { %v69_v6 = vsub.f32 %v57_v0, %v67_v5 }
  0xac   :  { %v65_v7 = vpop.xlane.xlu0 %64 }
  0xad   :  { %v68_v8 = vmul.f32 0.03125, %v65_v7  ;;  %v71_v9 = vmul.f32 %v69_v6, %v69_v6 }
  0xaf   :  { %v70_v10 = vsub.f32 %v58_v1, %v68_v8  ;;  %v73_v11 = vsel %vm59_vm0, %v71_v9, 0.0 }
  0xb0   :  { %74 = vadd.xlane.f32.xlu1 %v73_v11 }
  0xb1   :  { %v72_v12 = vmul.f32 %v70_v10, %v70_v10 }
  0xb3   :  { %v76_v13 = vsel %vm59_vm0, %v72_v12, 0.0 }
  0xb4   :  { %77 = vadd.xlane.f32.xlu1 %v76_v13 }
 0x139   :  { %v75_v17 = vpop.xlane.xlu1 %74 }
 0x13a   :  { %v79_v18 = vmul.f32 0.03125, %v75_v17 }
 0x13c   :  { %v81_v19 = vadd.f32 1e-05, %v79_v18 }
 0x13d   :  { %v78_v20 = vpop.xlane.xlu1 %77 }
 0x13e   :  { %248 = vrsqrt.f32 %v81_v19  ;;  %v80_v21 = vmul.f32 0.03125, %v78_v20 }
 0x140   :  { %v82_v22 = vadd.f32 1e-05, %v80_v21 }
 0x142   :  { %250 = vrsqrt.f32 %v82_v22 }
 0x14b   :  { %v249_v23 = vpop.eup %248 }
 0x14c   :  { %v85_v24 = vmul.f32 %v249_v23, %v69_v6 }
 0x14e   :  { %v94_v28 = vmul.f32 %v216_v25, %v85_v24 }
 0x14f   :  { %v251_v26 = vpop.eup %250 }
 0x150   :  { %v86_v27 = vmul.f32 %v251_v26, %v70_v10  ;;  %v103_v31 = vadd.f32 %v217_v29, %v94_v28 }
 0x152   :  { %v95_v30 = vmul.f32 %v216_v25, %v86_v27 }
 0x154   :  { %v104_v32 = vadd.f32 %v217_v29, %v95_v30 }
 0x156   :  { %v105_v33 = vpack.c.bf16 %v104_v32, %v103_v31 }
 0x158   :  { %234 = vmatmul.mubr.msk.bf16.vlgmr.msra.gmra.mxu0 %vm59_vm0, %v105_v33 }
 0x218   :  { %v161_v35 = vpop.f32.mrf.mxu0 }
 0x219   :  { %v168_v36 = vadd.f32 %v161_v35, %v110_v34 }
 0x21a   :  { %v235_v37 = vpop.f32.mrf.mxu0 }
 0x21b   :  { %171 = vst.msk [vmem:[#allocation2] sm:$0xff] %vm54_vm1, %v168_v36 }
 0x21c   :  { %v164_v39 = vpop.f32.mrf.mxu0 }
 0x21d   :  { %v169_v40 = vadd.f32 %v164_v39, %v111_v38 }
 0x21e   :  { %v236_v41 = vpop.f32.mrf.mxu0 }
 0x21f   :  { %172 = vst.msk [vmem:[#allocation2 + $0x8] sm:$0xff] %vm54_vm1, %v169_v40 }
 0x222   :  { %v176_v43 = vld [vmem:[#allocation2] sm:$0xff] }
 0x223   :  { %v185_v44 = vadd.f32 %v221_v42, %v176_v43 }
 0x225   :  { %v224_v45 = vpack.c.bf16 %v185_v44, %v185_v44 }
 0x226   :  { %v177_v46 = vld [vmem:[#allocation2 + $0x8] sm:$0xff] }
 0x227   :  { %v186_v47 = vadd.f32 %v221_v42, %v177_v46  ;;  %196 = vst.msk [vmem:[#allocation8] sm:$0xf] %vm195_vm3, %v224_v45 }
 0x229   :  { %v225_v48 = vpack.c.bf16 %v186_v47, %v186_v47 }
 0x22b   :  { %197 = vst.msk [vmem:[#allocation8 + $0x4] sm:$0xf] %vm195_vm3, %v225_v48 }
 0x22c   :  { %303 = shalt.err (!%p300_p0)
}
 0x22d   :  { %209 = dma.vmem_to_hbm [thread:$0]  %s204_s10, 128, %s395_s5, [#allocation5], %s322_s28, %s322_s28, %s323_s29  }
 0x22e   :  { %316 = dma.done.wait [#allocation5], 128  }
 0x22f   :  { %317 = vsyncadd [#allocation5], 4294967168 }
 0x230   :  { %213 = vsyncpa [#allocation4], 1 }
 0x231   :  { %214 = vsyncpa [#allocation7], 1 }
 0x232   :  { %215 = vsyncpa [#allocation5], 1 }

</bundles_post_ra>
